<compile_context>
chip_gen: v5e
topology: v5e:2x2
jax: 0.10.0
libtpu: 0.0.40
codegen_flags: <defaults>
</compile_context>

<pallas_src>
import functools

import jax
import jax.numpy as jnp
from jax.experimental import pallas as pl
from jax.experimental.pallas import tpu as pltpu

IN_FEATURES = 128
OUT_FEATURES = 63
LANE = 128                                              # TPU lane width
OUT_PAD = ((OUT_FEATURES + LANE - 1) // LANE) * LANE    # -> 128
TM_MAX = 512                                            # rows per grid step


def _linear_sub_kernel(x_ref, w_ref, b_ref, out_ref):
    """One (tm, IN) row tile.

    acc            = x @ w                (MXU, f32 accumulate)
    out[:, :128]   = acc + b[0]           (= v1 ; lanes >= 63 are 0)
    out[:, 128:]   = acc + b[1]           (= v2 ; lanes >= 63 are 0, since
                                            b[1] = bias - other only on valid lanes)
    """
    x = x_ref[...]                                        # (tm, IN)
    w = w_ref[...]                                        # (IN, OUT_PAD), resident
    acc = jnp.dot(x, w, preferred_element_type=jnp.float32)   # (tm, OUT_PAD)
    out_ref[:, :OUT_PAD] = (acc + b_ref[0:1, :]).astype(out_ref.dtype)
    out_ref[:, OUT_PAD:] = (acc + b_ref[1:2, :]).astype(out_ref.dtype)


def prepare_params(weight, bias, out_pad=OUT_PAD):
    """One-time init (nn.Module.__init__ analogue): transpose + lane-pad params."""
    out_f, in_f = weight.shape
    w_prep = jnp.zeros((in_f, out_pad), weight.dtype).at[:, :out_f].set(weight.T)
    b_prep = jnp.zeros((1, out_pad), bias.dtype).at[0, :out_f].set(bias)
    return w_prep, b_prep


@functools.partial(jax.jit, static_argnames=("out_features",))
def linear_sub_padded(x, w_prep, b_prep, other=1.3, *, out_features=OUT_FEATURES):
    """Returns the lane-packed (B, 2*OUT_PAD) slab: [:, :128]=v1, [:, 128:]=v2.

    Lanes >= out_features are zero in both halves. This is the preferred,
    HBM-traffic-minimal interface for downstream consumers.
    """
    B, in_f = x.shape
    out_pad = w_prep.shape[1]

    # Fold `other` into a second bias row (masked to valid lanes) -> no scalar
    # input to the kernel and clean zero padding in the v2 half.
    valid = (jnp.arange(out_pad) < out_features).astype(b_prep.dtype)     # (OUT_PAD,)
    b2 = b_prep - jnp.asarray(other, b_prep.dtype) * valid[None, :]
    b12 = jnp.concatenate([b_prep, b2], axis=0)                           # (2, OUT_PAD)

    # Row-tile size: full batch if small (block == full dim is always legal),
    # otherwise 512-row tiles; ragged last block is handled by Pallas masking.
    tm = B if B <= TM_MAX else TM_MAX
    grid = (pl.cdiv(B, tm),)

    cost = pl.CostEstimate(
        flops=2 * B * in_f * out_pad,
        transcendentals=0,
        bytes_accessed=(x.size + w_prep.size + b12.size + B * 2 * out_pad) * 4,
    )

    packed = pl.pallas_call(
        _linear_sub_kernel,
        out_shape=jax.ShapeDtypeStruct((B, 2 * out_pad), x.dtype),
        grid=grid,
        in_specs=[
            pl.BlockSpec((tm, in_f), lambda i: (i, 0)),        # x row tile (streamed)
            pl.BlockSpec((in_f, out_pad), lambda i: (0, 0)),   # weight, VMEM-resident
            pl.BlockSpec((2, out_pad), lambda i: (0, 0)),      # biases, VMEM-resident
        ],
        out_specs=pl.BlockSpec((tm, 2 * out_pad), lambda i: (i, 0)),
        compiler_params=pltpu.CompilerParams(
            dimension_semantics=("parallel",),       # megacore split on v7x
            vmem_limit_bytes=32 * 1024 * 1024,       # ample headroom on v5e/v6e/v7x
        ),
        cost_estimate=cost,
    )(x, w_prep, b12)
    return packed


def model_forward(x, w_prep, b_prep, other=1.3, *, out_features=OUT_FEATURES):
    """PyTorch-equivalent forward: returns (v1, v2) with shape (B, 63).

    NOTE: perf-sensitive consumers should use linear_sub_padded() directly and
    keep the lane-padded slab; the slices below exist only to match the
    original module's return signature.
    """
    packed = linear_sub_padded(x, w_prep, b_prep, other, out_features=out_features)
    out_pad = w_prep.shape[1]
    v1 = packed[:, :out_features]
    v2 = packed[:, out_pad:out_pad + out_features]
    return v1, v2


if __name__ == "__main__":
    key = jax.random.PRNGKey(0)
    k_x, k_w, k_b, k_xb = jax.random.split(key, 4)

    # Deterministic "parameters" (PyTorch Linear(128, 63) shapes).
    weight = jax.random.uniform(
        k_w, (OUT_FEATURES, IN_FEATURES), jnp.float32, minval=-1.0, maxval=1.0
    ) / jnp.sqrt(IN_FEATURES)
    bias = jax.random.uniform(
        k_b, (OUT_FEATURES,), jnp.float32, minval=-1.0, maxval=1.0
    ) / jnp.sqrt(IN_FEATURES)

    # One-off init-time preparation (transpose + lane pad).
    w_prep, b_prep = prepare_params(weight, bias)

    # --- Module-shaped test case: x1 = (1, 128), other = 1.3 ---
    x1 = jax.random.normal(k_x, (1, IN_FEATURES), jnp.float32)
    v1, v2 = model_forward(x1, w_prep, b_prep, 1.3)
    jax.block_until_ready((v1, v2))

    ref_v1 = x1 @ weight.T + bias
    ref_v2 = ref_v1 - 1.3
    assert v1.shape == (1, OUT_FEATURES) and v2.shape == (1, OUT_FEATURES)
    assert jnp.allclose(v1, ref_v1, atol=1e-5), "v1 mismatch"
    assert jnp.allclose(v2, ref_v2, atol=1e-5), "v2 mismatch"

    # --- Batched path test: exercises the M-grid with a ragged last tile ---
    xb = jax.random.normal(k_xb, (600, IN_FEATURES), jnp.float32)
    v1b, v2b = model_forward(xb, w_prep, b_prep, 1.3)
    jax.block_until_ready((v1b, v2b))
    ref_v1b = xb @ weight.T + bias
    assert jnp.allclose(v1b, ref_v1b, atol=1e-4), "batched v1 mismatch"
    assert jnp.allclose(v2b, ref_v1b - 1.3, atol=1e-4), "batched v2 mismatch"

    print("KERNEL_OK")
</pallas_src>

<mosaic_0001>
module attributes {stable_mosaic.version = 11 : i64} {
  func.func @_linear_sub_kernel(%arg0: i32, %arg1: memref<1x128xf32, #tpu.memory_space<vmem>>, %arg2: memref<128x128xf32, #tpu.memory_space<vmem>>, %arg3: memref<2x128xf32, #tpu.memory_space<vmem>>, %arg4: memref<1x256xf32, #tpu.memory_space<vmem>>) attributes {dimension_semantics = [#tpu.dimension_semantics<parallel>], iteration_bounds = array<i64: 1>, scalar_prefetch = 0 : i64, scratch_operands = 0 : i64, tpu.core_type = #tpu.core_type<tc>, window_params = [{transform_indices = @transform_0, window_bounds = array<i64: 1, 128>}, {pipeline_mode = #tpu.pipeline_mode<synchronous>, transform_indices = @transform_1, window_bounds = array<i64: 128, 128>}, {pipeline_mode = #tpu.pipeline_mode<synchronous>, transform_indices = @transform_2, window_bounds = array<i64: 2, 128>}, {transform_indices = @transform_3, window_bounds = array<i64: 1, 256>}]} {
    %c0 = arith.constant 0 : index
    %c0_0 = arith.constant 0 : index
    %0 = vector.load %arg1[%c0, %c0_0] : memref<1x128xf32, #tpu.memory_space<vmem>>, vector<1x128xf32>
    %c0_1 = arith.constant 0 : index
    %c0_2 = arith.constant 0 : index
    %1 = vector.load %arg2[%c0_1, %c0_2] : memref<128x128xf32, #tpu.memory_space<vmem>>, vector<128x128xf32>
    %cst = arith.constant dense<0.000000e+00> : vector<1x128xf32>
    %2 = tpu.matmul %0, %1, %cst {dimension_numbers = #tpu.dot_dimension_numbers<[1], [0], [0], [1], [0, 0, 1, 1], [], []>} : vector<1x128xf32>, vector<128x128xf32>, vector<1x128xf32> -> vector<1x128xf32>
    %c0_3 = arith.constant 0 : index
    %c0_4 = arith.constant 0 : index
    %3 = vector.load %arg3[%c0_3, %c0_4] : memref<2x128xf32, #tpu.memory_space<vmem>>, vector<1x128xf32>
    %4 = arith.addf %2, %3 : vector<1x128xf32>
    %c0_5 = arith.constant 0 : index
    %c0_6 = arith.constant 0 : index
    %5 = vector.load %arg4[%c0_5, %c0_6] : memref<1x256xf32, #tpu.memory_space<vmem>>, vector<1x128xf32>
    tpu.vector_store %arg4[%c0_5, %c0_6], %4 {strides = array<i32>} : memref<1x256xf32, #tpu.memory_space<vmem>>, vector<1x128xf32>,
    %c1 = arith.constant 1 : index
    %c0_7 = arith.constant 0 : index
    %6 = vector.load %arg3[%c1, %c0_7] : memref<2x128xf32, #tpu.memory_space<vmem>>, vector<1x128xf32>
    %7 = arith.addf %2, %6 : vector<1x128xf32>
    %c0_8 = arith.constant 0 : index
    %c128 = arith.constant 128 : index
    %8 = vector.load %arg4[%c0_8, %c128] : memref<1x256xf32, #tpu.memory_space<vmem>>, vector<1x128xf32>
    tpu.vector_store %arg4[%c0_8, %c128], %7 {strides = array<i32>} : memref<1x256xf32, #tpu.memory_space<vmem>>, vector<1x128xf32>,
    return
  }
  func.func @transform_0(%arg0: i32) -> (i32, i32) {
    %c0_i32 = arith.constant 0 : i32
    %c0_i32_0 = arith.constant 0 : i32
    return %arg0, %c0_i32 : i32, i32
  }
  func.func @transform_1(%arg0: i32) -> (i32, i32) {
    %c0_i32 = arith.constant 0 : i32
    %c0_i32_0 = arith.constant 0 : i32
    %c0_i32_1 = arith.constant 0 : i32
    return %c0_i32, %c0_i32_0 : i32, i32
  }
  func.func @transform_2(%arg0: i32) -> (i32, i32) {
    %c0_i32 = arith.constant 0 : i32
    %c0_i32_0 = arith.constant 0 : i32
    %c0_i32_1 = arith.constant 0 : i32
    return %c0_i32, %c0_i32_0 : i32, i32
  }
  func.func @transform_3(%arg0: i32) -> (i32, i32) {
    %c0_i32 = arith.constant 0 : i32
    %c0_i32_0 = arith.constant 0 : i32
    return %arg0, %c0_i32 : i32, i32
  }
}

</mosaic_0001>

<bundles_post_ra>
// kernel: linear_sub_padded.1
= control target key start
LH: loop header
LB: loop body
LE: loop exit
PB: predicated region body
PF: predicated region fallthrough
CT: control target
= control target key end

     0   :  { %8 = vsyncpa [#allocation3], 0  ;;  %s190_s0 = inlined_call_operand.vmem [shape: f32[1,128], index: 0, kind: input, shape index: {}]   ;;  %s191_s1 = inlined_call_operand.hbm [shape: f32[128,128], index: 1, kind: input, shape index: {}]   ;;  %s192_s2 = inlined_call_operand.vmem [shape: f32[2,128], index: 2, kind: input, shape index: {}]   ;;  %s193_s3 = inlined_call_operand.hbm [shape: f32[1,256], index: 3, kind: output, shape index: {}]  }
   0x1   :  { %9 = vsyncpa [#allocation4], 0  ;;  %s16_s14 = sshll.u32 %s191_s1, 4  ;;  %s151_s15 = smov [#allocation2]   ;;  %s17_s14 = int_to_ptr.hbm [resolvable:$true] %s16_s14 }
   0x2   :  { %s18_s16 = sshll.u32 %s151_s15, 4  ;;  %s152_s17 = smov 128   ;;  %s19_s16 = int_to_ptr.vmem [resolvable:$true] %s18_s16 }
   0x3   :  { %s153_s18 = smov 8  }
   0x4   :  { %24 = dma.hbm_to_vmem [thread:$0]  %s17_s14, 2048, %s19_s16, [#allocation3], %s152_s17, %s152_s17, %s153_s18  }
   0x5   :  { %147 = dma.done.wait [#allocation3], 2048  }
   0x6   :  { %148 = vsyncadd [#allocation3], 4294965248  ;;  %v47_v0 = vld [vmem:[#allocation2 + $0x78] sm:$0xff]  ;;  %v46_v1 = vld [vmem:[#allocation2 + $0x70] sm:$0xff]  ;;  %v70_v17 = vlaneseq  ;;  %s154_s24 = smov [#allocation5]   ;;  %s85_s28 = sshll.u32 %s193_s3, 4  ;;  %s86_s28 = int_to_ptr.hbm [resolvable:$true] %s85_s28 }
   0x7   :  { %48 = vmatpush.msra.mxu0 %v47_v0  ;;  %v45_v2 = vld [vmem:[#allocation2 + $0x68] sm:$0xff]  ;;  %v44_v3 = vld [vmem:[#allocation2 + $0x60] sm:$0xff]  ;;  %v43_v4 = vld [vmem:[#allocation2 + $0x58] sm:$0xff]  ;;  %s83_s25 = sshll.u32 %s154_s24, 4  ;;  %s84_s25 = int_to_ptr.vmem [resolvable:$true] %s83_s25 }
   0x8   :  { %v42_v5 = vld [vmem:[#allocation2 + $0x50] sm:$0xff]  ;;  %v41_v6 = vld [vmem:[#allocation2 + $0x48] sm:$0xff]  ;;  %v40_v7 = vld [vmem:[#allocation2 + $0x40] sm:$0xff]  ;;  %vm72_vm0 = vcmp.lt.s32.totalorder %v70_v17, 128 }
   0x9   :  { %49 = vmatpush.msra.mxu0 %v46_v1  ;;  %v39_v8 = vld [vmem:[#allocation2 + $0x38] sm:$0xff]  ;;  %v38_v9 = vld [vmem:[#allocation2 + $0x30] sm:$0xff]  ;;  %v37_v10 = vld [vmem:[#allocation2 + $0x28] sm:$0xff] }
   0xa   :  { %v36_v11 = vld [vmem:[#allocation2 + $0x20] sm:$0xff]  ;;  %v35_v12 = vld [vmem:[#allocation2 + $0x18] sm:$0xff]  ;;  %v34_v13 = vld [vmem:[#allocation2 + $0x10] sm:$0xff] }
   0xb   :  { %50 = vmatpush.msra.mxu0 %v45_v2  ;;  %v33_v14 = vld [vmem:[#allocation2 + $0x8] sm:$0xff]  ;;  %v32_v15 = vld [vmem:[#allocation2] sm:$0xff] }
   0xc   :  { %v31_v16 = vld [vmem:[%s190_s0] sm:$0x1]  ;;  %v75_v19 = vld [vmem:[%s192_s2 + $0x1] sm:$0x1] }
   0xd   :  { %51 = vmatpush.msra.mxu0 %v44_v3  ;;  %v68_v18 = vld [vmem:[%s192_s2] sm:$0x1] }
   0xf   :  { %52 = vmatpush.msra.mxu0 %v43_v4 }
  0x11   :  { %53 = vmatpush.msra.mxu0 %v42_v5 }
  0x13   :  { %54 = vmatpush.msra.mxu0 %v41_v6 }
  0x15   :  { %55 = vmatpush.msra.mxu0 %v40_v7 }
  0x17   :  { %56 = vmatpush.msra.mxu0 %v39_v8 }
  0x19   :  { %57 = vmatpush.msra.mxu0 %v38_v9 }
  0x1b   :  { %58 = vmatpush.msra.mxu0 %v37_v10 }
  0x1d   :  { %59 = vmatpush.msra.mxu0 %v36_v11 }
  0x1f   :  { %60 = vmatpush.msra.mxu0 %v35_v12 }
  0x21   :  { %61 = vmatpush.msra.mxu0 %v34_v13 }
  0x23   :  { %62 = vmatpush.msra.mxu0 %v33_v14 }
  0x25   :  { %63 = vmatpush.msra.mxu0 %v32_v15 }
  0x26   :  { %64 = vmatmul.f32.vlgmr.msra.gmra.mxu0 %v31_v16 }
  0xa3   :  { %v65_v20 = vpop.f32.mrf.mxu0 }
  0xa4   :  { %v69_v21 = vadd.f32 %v68_v18, %v65_v20  ;;  %v76_v22 = vadd.f32 %v75_v19, %v65_v20 }
  0xa6   :  { %74 = vst.msk [vmem:[#allocation5] sm:$0x1] %vm72_vm0, %v69_v21 }
  0xa7   :  { %77 = vst.msk [vmem:[#allocation5 + $0x1] sm:$0x1] %vm72_vm0, %v76_v22 }
  0xa8   :  { %88 = dma.vmem_to_hbm [thread:$0]  %s84_s25, 32, %s86_s28, [#allocation4]  }
  0xa9   :  { %149 = dma.done.wait [#allocation4], 32  }
  0xaa   :  { %150 = vsyncadd [#allocation4], 4294967264 }
  0xab   :  { %93 = vsyncpa [#allocation3], 1 }
  0xac   :  { %94 = vsyncpa [#allocation4], 1 }

</bundles_post_ra>
